<compile_context>
chip_gen: v5e
topology: v5e:2x2
jax: 0.10.0
libtpu: 0.0.40
codegen_flags: <defaults>
</compile_context>

<pallas_src>
import jax
import jax.numpy as jnp
from jax.experimental import pallas as pl
from jax.experimental.pallas import tpu as pltpu

HIDDEN = 64
OUT = 2


def _round_up(x, m):
    return (x + m - 1) // m * m


def _mlp_kernel(x_ref, w1_ref, b1_ref, w2_ref, b2_ref, o_ref):
    # h = relu(x @ W1 + b1): f32 accumulation on the MXU, f32 bias/ReLU on the VPU.
    h = jnp.dot(x_ref[...], w1_ref[...], preferred_element_type=jnp.float32)
    h = jnp.maximum(h + b1_ref[...], 0.0)
    # out = h @ W2 + b2 (N=2 is tiny; the masked-store volume of a (TB, 2) block is noise).
    o = jnp.dot(h.astype(w2_ref.dtype), w2_ref[...], preferred_element_type=jnp.float32)
    o_ref[...] = (o + b2_ref[...]).astype(o_ref.dtype)


def action_type_classifier(x, w1, b1, w2, b2, *, block_rows=None):
    """x: (..., input_dim) -> (..., 2), matching nn.Linear's leading-dim handling."""
    orig_shape = x.shape
    in_dim = orig_shape[-1]
    x2d = x.reshape(-1, in_dim)
    B = x2d.shape[0]

    # Stream x in the dtype it arrives in (f32 / bf16 feed the MXU natively); anything
    # exotic is promoted to f32.  Only the tiny weights get an eager cast to match x.
    if x2d.dtype not in (jnp.dtype(jnp.float32), jnp.dtype(jnp.bfloat16)):
        x2d = x2d.astype(jnp.float32)
    x_dtype = x2d.dtype
    out_dtype = x_dtype

    w1c = w1.astype(x_dtype)
    w2c = w2.astype(x_dtype)
    b1_2d = b1.reshape(1, HIDDEN).astype(jnp.float32)
    b2_2d = b2.reshape(1, OUT).astype(jnp.float32)

    x_item = jnp.dtype(x_dtype).itemsize
    w_item = jnp.dtype(w1c.dtype).itemsize
    o_item = jnp.dtype(out_dtype).itemsize

    # Sublane packing multiple for the batch-tile: 8 (f32), 16 (bf16), 32 (8-bit).
    mult = {4: 8, 2: 16, 1: 32}.get(x_item, 8)

    # Generation-aware VMEM budgeting.
    try:
        vmem_cap = pltpu.get_tpu_info().vmem_capacity_bytes
    except Exception:  # pragma: no cover - fall back to the smallest (v7x) capacity
        vmem_cap = 64 << 20
    big_vmem = vmem_cap >= (128 << 20)            # v5e / v6e
    x_tile_budget = (24 << 20) if big_vmem else (8 << 20)   # total for the 2 x buffers
    limit_cap = (64 << 20) if big_vmem else (32 << 20)
    if block_rows is None:
        block_rows = 2048 if big_vmem else 1024

    # Batch tile: as large as possible (hide the x DMA) within the budget, multiple of `mult`.
    tb_cap = max(mult, (x_tile_budget // (2 * in_dim * x_item)) // mult * mult)
    TB = max(mult, min(_round_up(block_rows, mult), tb_cap, _round_up(B, mult)))
    grid = (pl.cdiv(B, TB),)   # partial last block handled by Pallas masking (no batch pad)

    vmem_needed = (
        2 * TB * in_dim * x_item                              # double-buffered x tiles
        + 2 * TB * OUT * o_item                               # double-buffered output tiles
        + 2 * (in_dim * HIDDEN + HIDDEN * OUT) * w_item       # weights (incl. 2nd buffer)
        + 2 * 2 * (HIDDEN + OUT) * 4                          # biases (incl. 2nd buffer)
        + TB * HIDDEN * 4 + TB * OUT * 4                      # f32 temporaries
    )
    vmem_limit = int(min(limit_cap, max(vmem_needed + (4 << 20), 8 << 20)))

    cost = pl.CostEstimate(
        flops=2 * B * in_dim * HIDDEN + 2 * B * HIDDEN * OUT,
        transcendentals=0,
        bytes_accessed=(x2d.size * x_item + (w1c.size + w2c.size) * w_item
                        + (HIDDEN + OUT) * 4 + B * OUT * o_item),
    )

    out = pl.pallas_call(
        _mlp_kernel,
        out_shape=jax.ShapeDtypeStruct((B, OUT), out_dtype),
        grid_spec=pltpu.PrefetchScalarGridSpec(
            num_scalar_prefetch=0,
            grid=grid,
            in_specs=[
                pl.BlockSpec((TB, in_dim), lambda i: (i, 0)),      # batch-tiled x (pipelined)
                pl.BlockSpec((in_dim, HIDDEN), lambda i: (0, 0)),  # W1, VMEM-resident
                pl.BlockSpec((1, HIDDEN), lambda i: (0, 0)),       # b1
                pl.BlockSpec((HIDDEN, OUT), lambda i: (0, 0)),     # W2
                pl.BlockSpec((1, OUT), lambda i: (0, 0)),          # b2
            ],
            out_specs=pl.BlockSpec((TB, OUT), lambda i: (i, 0)),
        ),
        compiler_params=pltpu.CompilerParams(
            dimension_semantics=("parallel",),   # shard batch tiles across TCs on v7x
            vmem_limit_bytes=vmem_limit,
        ),
        cost_estimate=cost,
    )(x2d, w1c, b1_2d, w2c, b2_2d)

    return out.reshape(*orig_shape[:-1], OUT)


def init_params(key, input_dim):
    """PyTorch nn.Linear-style init (U[-1/sqrt(fan_in), 1/sqrt(fan_in)]).

    Weights stored as (in_features, out_features) == PyTorch weight.T
    """
    k1, k2, k3, k4 = jax.random.split(key, 4)
    bound1 = 1.0 / (input_dim ** 0.5)
    bound2 = 1.0 / (HIDDEN ** 0.5)
    w1 = jax.random.uniform(k1, (input_dim, HIDDEN), jnp.float32, -bound1, bound1)
    b1 = jax.random.uniform(k2, (HIDDEN,), jnp.float32, -bound1, bound1)
    w2 = jax.random.uniform(k3, (HIDDEN, OUT), jnp.float32, -bound2, bound2)
    b2 = jax.random.uniform(k4, (OUT,), jnp.float32, -bound2, bound2)
    return w1, b1, w2, b2


def _reference(x, w1, b1, w2, b2):
    return jnp.maximum(x @ w1 + b1, 0.0) @ w2 + b2


if __name__ == "__main__":
    key = jax.random.PRNGKey(0)
    kx, kx2, kp = jax.random.split(key, 3)

    batch = 4
    input_dim = 32
    w1, b1, w2, b2 = init_params(kp, input_dim)

    # Case 1: tiny batch, single (partial) tile, non-128 K streamed without padding.
    x = jax.random.normal(kx, (batch, input_dim), jnp.float32)
    out = jax.block_until_ready(action_type_classifier(x, w1, b1, w2, b2))
    ref = _reference(x, w1, b1, w2, b2)
    assert out.shape == (batch, OUT), out.shape
    assert jnp.allclose(out, ref, atol=1e-5, rtol=1e-5), "mismatch vs reference (case 1)"

    # Case 2: multi-dim leading shape, B=21 with TB=8 -> grid of 3 with a masked partial
    # last block (no wrapper batch pad).
    x2 = jax.random.normal(kx2, (3, 7, input_dim), jnp.float32)
    out2 = jax.block_until_ready(
        action_type_classifier(x2, w1, b1, w2, b2, block_rows=8))
    ref2 = _reference(x2.reshape(-1, input_dim), w1, b1, w2, b2).reshape(3, 7, OUT)
    assert out2.shape == (3, 7, OUT), out2.shape
    assert jnp.allclose(out2, ref2, atol=1e-5, rtol=1e-5), "mismatch vs reference (case 2)"

    # Case 3: x arrives already in bf16 (the only sensible bf16 usage per review); the
    # kernel streams it as-is with f32 accumulation.  Loose tolerance for bf16 rounding.
    x3 = x.astype(jnp.bfloat16)
    out3 = jax.block_until_ready(action_type_classifier(x3, w1, b1, w2, b2))
    ref3 = _reference(x3.astype(jnp.float32), w1, b1, w2, b2)
    assert out3.shape == (batch, OUT), out3.shape
    assert jnp.allclose(out3.astype(jnp.float32), ref3, atol=5e-2, rtol=5e-2), \
        "mismatch vs reference (case 3, bf16)"

    print("KERNEL_OK")
</pallas_src>

<mosaic_0001>
module attributes {stable_mosaic.version = 11 : i64} {
  func.func @_mlp_kernel(%arg0: i32, %arg1: memref<8x32xf32, #tpu.memory_space<vmem>>, %arg2: memref<32x64xf32, #tpu.memory_space<vmem>>, %arg3: memref<1x64xf32, #tpu.memory_space<vmem>>, %arg4: memref<64x2xf32, #tpu.memory_space<vmem>>, %arg5: memref<1x2xf32, #tpu.memory_space<vmem>>, %arg6: memref<8x2xf32, #tpu.memory_space<vmem>>) attributes {dimension_semantics = [#tpu.dimension_semantics<parallel>], iteration_bounds = array<i64: 1>, scalar_prefetch = 0 : i64, scratch_operands = 0 : i64, tpu.core_type = #tpu.core_type<tc>, window_params = [{transform_indices = @transform_0, window_bounds = array<i64: 8, 32>}, {pipeline_mode = #tpu.pipeline_mode<synchronous>, transform_indices = @transform_1, window_bounds = array<i64: 32, 64>}, {pipeline_mode = #tpu.pipeline_mode<synchronous>, transform_indices = @transform_2, window_bounds = array<i64: 1, 64>}, {pipeline_mode = #tpu.pipeline_mode<synchronous>, transform_indices = @transform_3, window_bounds = array<i64: 64, 2>}, {pipeline_mode = #tpu.pipeline_mode<synchronous>, transform_indices = @transform_4, window_bounds = array<i64: 1, 2>}, {transform_indices = @transform_5, window_bounds = array<i64: 8, 2>}]} {
    %c0 = arith.constant 0 : index
    %c0_0 = arith.constant 0 : index
    %0 = vector.load %arg1[%c0, %c0_0] : memref<8x32xf32, #tpu.memory_space<vmem>>, vector<8x32xf32>
    %c0_1 = arith.constant 0 : index
    %c0_2 = arith.constant 0 : index
    %1 = vector.load %arg2[%c0_1, %c0_2] : memref<32x64xf32, #tpu.memory_space<vmem>>, vector<32x64xf32>
    %cst = arith.constant dense<0.000000e+00> : vector<8x64xf32>
    %2 = tpu.matmul %0, %1, %cst {dimension_numbers = #tpu.dot_dimension_numbers<[1], [0], [0], [1], [0, 0, 1, 1], [], []>} : vector<8x32xf32>, vector<32x64xf32>, vector<8x64xf32> -> vector<8x64xf32>
    %c0_3 = arith.constant 0 : index
    %c0_4 = arith.constant 0 : index
    %3 = vector.load %arg3[%c0_3, %c0_4] : memref<1x64xf32, #tpu.memory_space<vmem>>, vector<1x64xf32>
    %4 = vector.broadcast %3 : vector<1x64xf32> to vector<8x64xf32>
    %5 = arith.addf %2, %4 : vector<8x64xf32>
    %cst_5 = arith.constant 0.000000e+00 : f32
    %6 = vector.broadcast %cst_5 : f32 to vector<8x64xf32>
    %7 = arith.maximumf %5, %6 : vector<8x64xf32>
    %c0_6 = arith.constant 0 : index
    %c0_7 = arith.constant 0 : index
    %8 = vector.load %arg4[%c0_6, %c0_7] : memref<64x2xf32, #tpu.memory_space<vmem>>, vector<64x2xf32>
    %cst_8 = arith.constant dense<0.000000e+00> : vector<8x2xf32>
    %9 = tpu.matmul %7, %8, %cst_8 {dimension_numbers = #tpu.dot_dimension_numbers<[1], [0], [0], [1], [0, 0, 1, 1], [], []>} : vector<8x64xf32>, vector<64x2xf32>, vector<8x2xf32> -> vector<8x2xf32>
    %c0_9 = arith.constant 0 : index
    %c0_10 = arith.constant 0 : index
    %10 = vector.load %arg5[%c0_9, %c0_10] : memref<1x2xf32, #tpu.memory_space<vmem>>, vector<1x2xf32>
    %11 = vector.broadcast %10 : vector<1x2xf32> to vector<8x2xf32>
    %12 = arith.addf %9, %11 : vector<8x2xf32>
    %c0_11 = arith.constant 0 : index
    %c0_12 = arith.constant 0 : index
    %13 = vector.load %arg6[%c0_11, %c0_12] : memref<8x2xf32, #tpu.memory_space<vmem>>, vector<8x2xf32>
    tpu.vector_store %arg6[%c0_11, %c0_12], %12 {strides = array<i32>} : memref<8x2xf32, #tpu.memory_space<vmem>>, vector<8x2xf32>,
    return
  }
  func.func @transform_0(%arg0: i32) -> (i32, i32) {
    %c0_i32 = arith.constant 0 : i32
    %c0_i32_0 = arith.constant 0 : i32
    return %arg0, %c0_i32 : i32, i32
  }
  func.func @transform_1(%arg0: i32) -> (i32, i32) {
    %c0_i32 = arith.constant 0 : i32
    %c0_i32_0 = arith.constant 0 : i32
    %c0_i32_1 = arith.constant 0 : i32
    return %c0_i32, %c0_i32_0 : i32, i32
  }
  func.func @transform_2(%arg0: i32) -> (i32, i32) {
    %c0_i32 = arith.constant 0 : i32
    %c0_i32_0 = arith.constant 0 : i32
    %c0_i32_1 = arith.constant 0 : i32
    return %c0_i32, %c0_i32_0 : i32, i32
  }
  func.func @transform_3(%arg0: i32) -> (i32, i32) {
    %c0_i32 = arith.constant 0 : i32
    %c0_i32_0 = arith.constant 0 : i32
    %c0_i32_1 = arith.constant 0 : i32
    return %c0_i32, %c0_i32_0 : i32, i32
  }
  func.func @transform_4(%arg0: i32) -> (i32, i32) {
    %c0_i32 = arith.constant 0 : i32
    %c0_i32_0 = arith.constant 0 : i32
    %c0_i32_1 = arith.constant 0 : i32
    return %c0_i32, %c0_i32_0 : i32, i32
  }
  func.func @transform_5(%arg0: i32) -> (i32, i32) {
    %c0_i32 = arith.constant 0 : i32
    %c0_i32_0 = arith.constant 0 : i32
    return %arg0, %c0_i32 : i32, i32
  }
}

</mosaic_0001>

<bundles_post_ra>
// kernel: tpu_custom_call.1
= control target key start
LH: loop header
LB: loop body
LE: loop exit
PB: predicated region body
PF: predicated region fallthrough
CT: control target
= control target key end

     0   :  { %vm29_vm0 = vcmask 261120   ;;  %vm66_vm1 = vcmask 523264   ;;  %vm90_vm2 = vcmask 15360   ;;  %s215_s0 = inlined_call_operand.vmem [shape: f32[4,32], index: 0, kind: input, shape index: {}]   ;;  %s216_s1 = inlined_call_operand.vmem [shape: f32[32,64], index: 1, kind: input, shape index: {}]   ;;  %s217_s2 = inlined_call_operand.vmem [shape: f32[1,64], index: 2, kind: input, shape index: {}]   ;;  %s218_s3 = inlined_call_operand.vmem [shape: f32[64,2], index: 3, kind: input, shape index: {}]   ;;  %s219_s4 = inlined_call_operand.vmem [shape: f32[1,2], index: 4, kind: input, shape index: {}]   ;;  %s220_s5 = inlined_call_operand.vmem [shape: f32[4,2], index: 5, kind: output, shape index: {}]  }
   0x1   :  { %v24_v0 = vld [vmem:[%s216_s1 + $0x18] sm:$0xff]  ;;  %v23_v1 = vld [vmem:[%s216_s1 + $0x10] sm:$0xff]  ;;  %v22_v3 = vld [vmem:[%s216_s1 + $0x8] sm:$0xff] }
   0x2   :  { %45 = vmatpush.msra.mxu0 %v24_v0  ;;  %v61_v2 = vld [vmem:[%s218_s3 + $0x38] sm:$0xff]  ;;  %v60_v4 = vld [vmem:[%s218_s3 + $0x30] sm:$0xff]  ;;  %v59_v5 = vld [vmem:[%s218_s3 + $0x28] sm:$0xff] }
   0x3   :  { %78 = vmatpush.msra.mxu1 %v61_v2  ;;  %v21_v6 = vld [vmem:[%s216_s1] sm:$0xff]  ;;  %v57_v9 = vld [vmem:[%s218_s3 + $0x18] sm:$0xff]  ;;  %v56_v10 = vld [vmem:[%s218_s3 + $0x10] sm:$0xff] }
   0x4   :  { %46 = vmatpush.msra.mxu0 %v23_v1  ;;  %v20_v7 = vld [vmem:[%s215_s0] sm:$0xff]  ;;  %v55_v11 = vld [vmem:[%s218_s3 + $0x8] sm:$0xff] }
   0x5   :  { %79 = vmatpush.msra.mxu1 %v60_v4  ;;  %v58_v8 = vld [vmem:[%s218_s3 + $0x20] sm:$0xff] }
   0x6   :  { %47 = vmatpush.msra.mxu0 %v22_v3  ;;  %v54_v12 = vld [vmem:[%s218_s3] sm:$0xff] }
   0x7   :  { %80 = vmatpush.msra.mxu1 %v59_v5  ;;  %v135_v13 = vld [vmem:[%s217_s2] ss:$0 sm:$0xff] }
   0x8   :  { %48 = vmatpush.msra.mxu0 %v21_v6  ;;  %v136_v17 = vld [vmem:[%s219_s4] ss:$0 sm:$0xff] }
   0x9   :  { %133 = vmatmul.msk.f32.vlgmr.msra.gmra.mxu0 %vm29_vm0, %v20_v7  ;;  %81 = vmatpush.msra.mxu1 %v58_v8 }
   0xb   :  { %82 = vmatpush.msra.mxu1 %v57_v9 }
   0xd   :  { %83 = vmatpush.msra.mxu1 %v56_v10 }
   0xf   :  { %84 = vmatpush.msra.mxu1 %v55_v11 }
  0x11   :  { %85 = vmatpush.msra.mxu1 %v54_v12 }
  0x86   :  { %v50_v14 = vpop.f32.mrf.mxu0 }
  0x87   :  { %v51_v15 = vadd.f32 %v135_v13, %v50_v14 }
  0x89   :  { %v53_v16 = vmax.f32 %v51_v15, 0.0 }
  0x8b   :  { %134 = vmatmul.msk.f32.vlgmr.msra.gmra.mxu1 %vm66_vm1, %v53_v16 }
 0x108   :  { %v87_v18 = vpop.f32.mrf.mxu1 }
 0x109   :  { %v88_v19 = vadd.f32 %v136_v17, %v87_v18 }
 0x10b   :  { %91 = vst.msk [vmem:[#allocation2] sm:$0xff] %vm90_vm2, %v88_v19 }
 0x112   :  { %v110_v20 = vld [vmem:[#allocation2] sm:$0xf] }
 0x113   :  { %111 = vst [vmem:[%s220_s5] sm:$0xf] %v110_v20 }

</bundles_post_ra>
